<compile_context>
chip_gen: v6e
topology: v6e:2x2x1
jax: 0.10.0
libtpu: 0.0.40
codegen_flags: <defaults>
</compile_context>

<pallas_src>
import jax
import jax.numpy as jnp
from jax.experimental import pallas as pl
from jax.experimental.pallas import tpu as pltpu


def skfusion_kernel(feats_ref, w1r_ref, bn_scale_ref, bn_bias_ref, w2_ref, out_ref):
    # feats_ref:    (1, height*C, HW)   -- row o = h*C + c
    # w1r_ref:      (height*C, d)       -- conv1 weight (C, d) replicated over heights
    # bn_scale_ref: (1, d)   bn_bias_ref: (1, d)   (eval-mode BN folded)
    # w2_ref:       (height*C, d)       -- conv2 weight, row o = h*C + c
    # out_ref:      (1, C, HW)
    HC = feats_ref.shape[1]
    HW = feats_ref.shape[2]
    C = out_ref.shape[1]
    height = HC // C

    feats = feats_ref[0]                                        # (height*C, HW)

    # Global average pool of feats_sum fused with the C-contraction of conv1:
    #   h_j = sum_c [ (1/HW) * sum_h sum_hw feats[h*C+c, hw] ] * w1[c, j]
    # rowsum is a single lane reduce; the height+channel sum happens implicitly
    # in the sublane reduce against the height-replicated weight.
    rowsum = jnp.sum(feats, axis=1, keepdims=True) * (1.0 / HW)  # (height*C, 1)
    h = jnp.sum(w1r_ref[...] * rowsum, axis=0, keepdims=True)    # (1, d)
    h = h * bn_scale_ref[...] + bn_bias_ref[...]                 # folded BatchNorm
    h = jnp.maximum(h, 0.0)                                      # ReLU

    # conv1x1 (d -> height*C): broadcast-mul + lane reduce -> per-channel column.
    logits = jnp.sum(w2_ref[...] * h, axis=1, keepdims=True)     # (height*C, 1)

    # Softmax over the height axis (rows h*C:(h+1)*C belong to height slot h);
    # columns stay per-channel so they lane-broadcast onto the (C, HW) tiles.
    ls = [logits[i * C:(i + 1) * C, :] for i in range(height)]   # each (C, 1)
    m = ls[0]
    for i in range(1, height):
        m = jnp.maximum(m, ls[i])
    es = [jnp.exp(l - m) for l in ls]
    den = es[0]
    for i in range(1, height):
        den = den + es[i]
    inv = 1.0 / den                                              # (C, 1)

    # Attention-weighted sum of the input features: (C, HW) * (C, 1) broadcast.
    acc = feats[0:C, :] * (es[0] * inv)
    for i in range(1, height):
        acc = acc + feats[i * C:(i + 1) * C, :] * (es[i] * inv)
    out_ref[0] = acc                                             # lane-dense store


def skfusion_pallas(in_feats, w1_t, bn_scale, bn_bias, w2):
    """in_feats: list of (B, C, H, W) float32 arrays (NCHW, like PyTorch)."""
    B, C, H, W = in_feats[0].shape
    height = len(in_feats)
    HW = H * W
    d = w1_t.shape[1]

    # NCHW list -> (B, height*C, HW): stack (== torch.cat) + free reshape, NO transpose.
    feats = jnp.stack(in_feats, axis=1).reshape(B, height * C, HW)
    # Replicate the conv1 weight over heights once (tiny constant) so the kernel's
    # pooled contraction is a single full-vreg broadcast-mul + sublane reduce.
    w1_rep = jnp.tile(w1_t, (height, 1))                         # (height*C, d)

    out = pl.pallas_call(
        skfusion_kernel,
        out_shape=jax.ShapeDtypeStruct((B, C, HW), jnp.float32),
        grid_spec=pltpu.PrefetchScalarGridSpec(
            num_scalar_prefetch=0,
            grid=(B,),
            in_specs=[
                pl.BlockSpec((1, height * C, HW), lambda b: (b, 0, 0)),
                pl.BlockSpec((height * C, d), lambda b: (0, 0)),
                pl.BlockSpec((1, d), lambda b: (0, 0)),
                pl.BlockSpec((1, d), lambda b: (0, 0)),
                pl.BlockSpec((height * C, d), lambda b: (0, 0)),
            ],
            out_specs=pl.BlockSpec((1, C, HW), lambda b: (b, 0, 0)),
        ),
        compiler_params=pltpu.CompilerParams(dimension_semantics=("parallel",)),
    )(feats, w1_rep, bn_scale, bn_bias, w2)

    # (B, C, HW) -> NCHW is a free reshape (already channel-major).
    return out.reshape(B, C, H, W)


def skfusion_ref(in_feats, w1_t, bn_scale, bn_bias, w2):
    """Pure-JAX reference, NCHW."""
    x = jnp.stack(in_feats, axis=1)                        # (B, height, C, H, W)
    B, height, C = x.shape[0], x.shape[1], x.shape[2]
    fsum = jnp.sum(x, axis=1)                              # (B, C, H, W)
    pooled = jnp.mean(fsum, axis=(2, 3))                   # (B, C)
    h = jnp.maximum(pooled @ w1_t * bn_scale + bn_bias, 0.0)   # (B, d)
    logits = (h @ w2.T).reshape(B, height, C)              # out-chan index = h*C + c
    attn = jax.nn.softmax(logits, axis=1)
    return jnp.sum(x * attn[:, :, :, None, None], axis=1)  # (B, C, H, W)


if __name__ == "__main__":
    # Module config: SKFusion(dim=4, height=2, reduction=4) -> d = max(4//4, 8) = 8
    dim, height, reduction = 4, 2, 4
    d = max(dim // reduction, 8)
    B, H, W = 2, 16, 16
    eps = 1e-5

    key = jax.random.PRNGKey(0)
    k1, k2, k3, k4, k5, k6, kx = jax.random.split(key, 7)

    # Deterministic synthetic parameters (shapes from the nn.Module __init__).
    w1 = 0.1 * jax.random.normal(k1, (d, dim), jnp.float32)           # Conv2d(dim, d, 1) weight, squeezed
    gamma = 1.0 + 0.1 * jax.random.normal(k2, (d,), jnp.float32)      # BatchNorm2d(d)
    beta = 0.1 * jax.random.normal(k3, (d,), jnp.float32)
    running_mean = 0.1 * jax.random.normal(k4, (d,), jnp.float32)
    running_var = jnp.abs(jax.random.normal(k5, (d,), jnp.float32)) + 0.5
    w2 = 0.1 * jax.random.normal(k6, (dim * height, d), jnp.float32)  # Conv2d(d, dim*height, 1) weight, squeezed

    # Fold BN (eval mode) into scale/bias; arrange conv weights for the kernel.
    inv_std = gamma / jnp.sqrt(running_var + eps)
    bn_scale = inv_std.reshape(1, d)
    bn_bias = (beta - running_mean * inv_std).reshape(1, d)
    w1_t = w1.T                                                       # (C, d)
    # w2 stays (height*C, d): row o = h*C + c, matching attn.view(B, height, C, 1, 1)

    in_feats = [
        jax.random.normal(jax.random.fold_in(kx, i), (B, dim, H, W), jnp.float32)
        for i in range(height)
    ]

    out = skfusion_pallas(in_feats, w1_t, bn_scale, bn_bias, w2)
    out = jax.block_until_ready(out)

    ref = skfusion_ref(in_feats, w1_t, bn_scale, bn_bias, w2)
    assert out.shape == (B, dim, H, W)
    assert jnp.allclose(out, ref, atol=2e-5, rtol=2e-5), float(jnp.max(jnp.abs(out - ref)))

    print("KERNEL_OK")
</pallas_src>

<mosaic_0001>
module attributes {stable_mosaic.version = 11 : i64} {
  func.func @skfusion_kernel(%arg0: i32, %arg1: memref<1x8x256xf32, #tpu.memory_space<vmem>>, %arg2: memref<8x8xf32, #tpu.memory_space<vmem>>, %arg3: memref<1x8xf32, #tpu.memory_space<vmem>>, %arg4: memref<1x8xf32, #tpu.memory_space<vmem>>, %arg5: memref<8x8xf32, #tpu.memory_space<vmem>>, %arg6: memref<1x4x256xf32, #tpu.memory_space<vmem>>) attributes {dimension_semantics = [#tpu.dimension_semantics<parallel>], iteration_bounds = array<i64: 2>, scalar_prefetch = 0 : i64, scratch_operands = 0 : i64, tpu.core_type = #tpu.core_type<tc>, window_params = [{transform_indices = @transform_0, window_bounds = array<i64: 1, 8, 256>}, {pipeline_mode = #tpu.pipeline_mode<synchronous>, transform_indices = @transform_1, window_bounds = array<i64: 8, 8>}, {pipeline_mode = #tpu.pipeline_mode<synchronous>, transform_indices = @transform_2, window_bounds = array<i64: 1, 8>}, {pipeline_mode = #tpu.pipeline_mode<synchronous>, transform_indices = @transform_3, window_bounds = array<i64: 1, 8>}, {pipeline_mode = #tpu.pipeline_mode<synchronous>, transform_indices = @transform_4, window_bounds = array<i64: 8, 8>}, {transform_indices = @transform_5, window_bounds = array<i64: 1, 4, 256>}]} {
    %c0 = arith.constant 0 : index
    %c0_0 = arith.constant 0 : index
    %c0_1 = arith.constant 0 : index
    %0 = vector.load %arg1[%c0, %c0_0, %c0_1] : memref<1x8x256xf32, #tpu.memory_space<vmem>>, vector<1x8x256xf32>
    %1 = vector.shape_cast %0 : vector<1x8x256xf32> to vector<8x256xf32>
    %cst = arith.constant dense<0.000000e+00> : vector<8xf32>
    %2 = vector.multi_reduction <add>, %1, %cst [1] : vector<8x256xf32> to vector<8xf32>
    %3 = vector.shape_cast %2 : vector<8xf32> to vector<8x1xf32>
    %cst_2 = arith.constant 3.906250e-03 : f32
    %4 = vector.broadcast %cst_2 : f32 to vector<8x1xf32>
    %5 = arith.mulf %3, %4 : vector<8x1xf32>
    %c0_3 = arith.constant 0 : index
    %c0_4 = arith.constant 0 : index
    %6 = vector.load %arg2[%c0_3, %c0_4] : memref<8x8xf32, #tpu.memory_space<vmem>>, vector<8x8xf32>
    %7 = vector.broadcast %5 : vector<8x1xf32> to vector<8x8xf32>
    %8 = arith.mulf %6, %7 : vector<8x8xf32>
    %cst_5 = arith.constant dense<0.000000e+00> : vector<8xf32>
    %9 = vector.multi_reduction <add>, %8, %cst_5 [0] : vector<8x8xf32> to vector<8xf32>
    %10 = vector.shape_cast %9 : vector<8xf32> to vector<1x8xf32>
    %c0_6 = arith.constant 0 : index
    %c0_7 = arith.constant 0 : index
    %11 = vector.load %arg3[%c0_6, %c0_7] : memref<1x8xf32, #tpu.memory_space<vmem>>, vector<1x8xf32>
    %12 = arith.mulf %10, %11 : vector<1x8xf32>
    %c0_8 = arith.constant 0 : index
    %c0_9 = arith.constant 0 : index
    %13 = vector.load %arg4[%c0_8, %c0_9] : memref<1x8xf32, #tpu.memory_space<vmem>>, vector<1x8xf32>
    %14 = arith.addf %12, %13 : vector<1x8xf32>
    %cst_10 = arith.constant 0.000000e+00 : f32
    %15 = vector.broadcast %cst_10 : f32 to vector<1x8xf32>
    %16 = arith.maximumf %14, %15 : vector<1x8xf32>
    %c0_11 = arith.constant 0 : index
    %c0_12 = arith.constant 0 : index
    %17 = vector.load %arg5[%c0_11, %c0_12] : memref<8x8xf32, #tpu.memory_space<vmem>>, vector<8x8xf32>
    %18 = vector.broadcast %16 : vector<1x8xf32> to vector<8x8xf32>
    %19 = arith.mulf %17, %18 : vector<8x8xf32>
    %cst_13 = arith.constant dense<0.000000e+00> : vector<8xf32>
    %20 = vector.multi_reduction <add>, %19, %cst_13 [1] : vector<8x8xf32> to vector<8xf32>
    %21 = vector.shape_cast %20 : vector<8xf32> to vector<8x1xf32>
    %22 = vector.extract_strided_slice %21 {offsets = [0, 0], sizes = [4, 1], strides = [1, 1]} : vector<8x1xf32> to vector<4x1xf32>
    %23 = vector.extract_strided_slice %21 {offsets = [4, 0], sizes = [4, 1], strides = [1, 1]} : vector<8x1xf32> to vector<4x1xf32>
    %24 = arith.maximumf %22, %23 : vector<4x1xf32>
    %25 = arith.subf %22, %24 : vector<4x1xf32>
    %26 = math.exp %25 : vector<4x1xf32>
    %27 = arith.subf %23, %24 : vector<4x1xf32>
    %28 = math.exp %27 : vector<4x1xf32>
    %29 = arith.addf %26, %28 : vector<4x1xf32>
    %cst_14 = arith.constant 1.000000e+00 : f32
    %30 = vector.broadcast %cst_14 : f32 to vector<4x1xf32>
    %31 = arith.divf %30, %29 : vector<4x1xf32>
    %32 = vector.extract_strided_slice %1 {offsets = [0, 0], sizes = [4, 256], strides = [1, 1]} : vector<8x256xf32> to vector<4x256xf32>
    %33 = arith.mulf %26, %31 : vector<4x1xf32>
    %34 = vector.broadcast %33 : vector<4x1xf32> to vector<4x256xf32>
    %35 = arith.mulf %32, %34 : vector<4x256xf32>
    %36 = vector.extract_strided_slice %1 {offsets = [4, 0], sizes = [4, 256], strides = [1, 1]} : vector<8x256xf32> to vector<4x256xf32>
    %37 = arith.mulf %28, %31 : vector<4x1xf32>
    %38 = vector.broadcast %37 : vector<4x1xf32> to vector<4x256xf32>
    %39 = arith.mulf %36, %38 : vector<4x256xf32>
    %40 = arith.addf %35, %39 : vector<4x256xf32>
    %c0_15 = arith.constant 0 : index
    %c0_16 = arith.constant 0 : index
    %c0_17 = arith.constant 0 : index
    %41 = vector.load %arg6[%c0_15, %c0_16, %c0_17] : memref<1x4x256xf32, #tpu.memory_space<vmem>>, vector<1x4x256xf32>
    %42 = vector.shape_cast %41 : vector<1x4x256xf32> to vector<4x256xf32>
    %43 = vector.shape_cast %40 : vector<4x256xf32> to vector<1x4x256xf32>
    tpu.vector_store %arg6[%c0_15, %c0_16, %c0_17], %43 {strides = array<i32>} : memref<1x4x256xf32, #tpu.memory_space<vmem>>, vector<1x4x256xf32>,
    return
  }
  func.func @transform_0(%arg0: i32) -> (i32, i32, i32) {
    %c0_i32 = arith.constant 0 : i32
    %c0_i32_0 = arith.constant 0 : i32
    %c0_i32_1 = arith.constant 0 : i32
    return %arg0, %c0_i32, %c0_i32_0 : i32, i32, i32
  }
  func.func @transform_1(%arg0: i32) -> (i32, i32) {
    %c0_i32 = arith.constant 0 : i32
    %c0_i32_0 = arith.constant 0 : i32
    %c0_i32_1 = arith.constant 0 : i32
    return %c0_i32, %c0_i32_0 : i32, i32
  }
  func.func @transform_2(%arg0: i32) -> (i32, i32) {
    %c0_i32 = arith.constant 0 : i32
    %c0_i32_0 = arith.constant 0 : i32
    %c0_i32_1 = arith.constant 0 : i32
    return %c0_i32, %c0_i32_0 : i32, i32
  }
  func.func @transform_3(%arg0: i32) -> (i32, i32) {
    %c0_i32 = arith.constant 0 : i32
    %c0_i32_0 = arith.constant 0 : i32
    %c0_i32_1 = arith.constant 0 : i32
    return %c0_i32, %c0_i32_0 : i32, i32
  }
  func.func @transform_4(%arg0: i32) -> (i32, i32) {
    %c0_i32 = arith.constant 0 : i32
    %c0_i32_0 = arith.constant 0 : i32
    %c0_i32_1 = arith.constant 0 : i32
    return %c0_i32, %c0_i32_0 : i32, i32
  }
  func.func @transform_5(%arg0: i32) -> (i32, i32, i32) {
    %c0_i32 = arith.constant 0 : i32
    %c0_i32_0 = arith.constant 0 : i32
    %c0_i32_1 = arith.constant 0 : i32
    return %arg0, %c0_i32, %c0_i32_0 : i32, i32, i32
  }
}

</mosaic_0001>

<bundles_post_ra>
// kernel: tpu_custom_call.1
= control target key start
LH: loop header
LB: loop body
LE: loop exit
PB: predicated region body
PF: predicated region fallthrough
CT: control target
= control target key end

     0   :  { %10 = vsyncpa [#allocation3], 0  ;;  %s906_s0 = inlined_call_operand.hbm [shape: f32[2,8,256], index: 0, kind: input, shape index: {}]   ;;  %s907_s1 = inlined_call_operand.hbm [shape: f32[8,8], index: 1, kind: input, shape index: {}]   ;;  %s908_s2 = inlined_call_operand.vmem [shape: f32[1,8], index: 2, kind: input, shape index: {}]   ;;  %s909_s3 = inlined_call_operand.vmem [shape: f32[1,8], index: 3, kind: input, shape index: {}]   ;;  %s910_s4 = inlined_call_operand.hbm [shape: f32[8,8], index: 4, kind: input, shape index: {}]   ;;  %s911_s5 = inlined_call_operand.hbm [shape: f32[2,4,256], index: 5, kind: output, shape index: {}]  }
   0x1   :  { %12 = vsyncpa [#allocation3 + $0x1], 0 }
   0x2   :  { %13 = vsyncpa [#allocation6], 0 }
   0x3   :  { %14 = vsyncpa [#allocation4], 0 }
   0x4   :  { %16 = vsyncpa [#allocation4 + $0x1], 0  ;;  %s732_s18 = smov 0   ;;  %s734_s19 = smov 0  }
   0x5   :  { %s736_s20 = smov 0   ;;  %s738_s21 = smov 0  }
   0x6 LB: > { %s753_s22 = sadd.s32 4294967295, %s695_s21   ;;  %s451_s23 = sadd.s32 4294967294, %s695_s21   ;;  %s695_s21 = sphi %s738_s21, %s933_s21   ;;  %s691_s20 = sphi %s736_s20, %s932_s20   ;;  %s687_s19 = sphi %s734_s19, %s931_s19   ;;  %s683_s18 = sphi %s732_s18, %s930_s18  }
   0x7   : > { %p42_p0 = scmp.ne.s32.totalorder %s687_s19, %s683_s18  ;;  %p912_p1 = scmp.eq.s32.totalorder %s753_s22, 0 }
   0x8   : > { %p156_p3 = scmp.eq.s32.totalorder %s451_s23, 1  ;;  %p452_p5 = scmp.ge.s32.totalorder %s695_s21, 1 }
   0x9   : > { %p762_p4 = por %p912_p1, %p42_p0  ;;  %p163_p7 = scmp.lt.s32.totalorder %s695_s21, 3 }
   0xa   : > { %p767_p6 = por %p156_p3, %p42_p0  ;;  %s697_s27 = smov [#allocation5]  }
   0xb   : > { %s916_s24 = scalar_select %p762_p4, 1, 0 }
   0xc   : > { %s917_s25 = scalar_select %p767_p6, 1, 0 }
   0xd   : > { %p772_p8 = pnand %p452_p5, %p163_p7  ;;  %s176_s28 = sshll.u32 %s697_s27, 4  ;;  %s177_s28 = int_to_ptr.vmem [resolvable:$true] %s176_s28 }
   0xe   : > { %s698_s29 = smov [#allocation7]   ;;  %s786_s7 = sadd.s32 1, %s695_s21  }
   0xf   : > { %s918_s26 = scalar_select %p772_p8, 1, 0 }
  0x10   : > { %p483_p10 = pneg %p772_p8  ;;  %s193_s30 = sshll.u32 %s698_s29, 4  ;;  %s194_s30 = int_to_ptr.vmem [resolvable:$true] %s193_s30 }
  0x11   : > { %s26_s8 = ssub.s32 %s695_s21, %s786_s7  ;;  %s558_s9 = scalar_lea.vmem %s177_s28, 128 }
  0x12   : > { %p781_p11 = pnand %p483_p10, %p912_p1  ;;  %p559_p13 = scmp.ne.s32.totalorder %s177_s28, %s558_s9 }
  0x13   : > { %p566_p5 = scmp.lt.s32.totalorder %s177_s28, %s177_s28  ;;  %p567_p7 = scmp.lt.s32.totalorder %s558_s9, %s558_s9 }
  0x14   : > { %p549_p12 = pneg %p781_p11 }
  0x15   : > { %p568_p10 = por %p567_p7, %p566_p5 }
  0x16   : > { %p561_p0 = pnand %p559_p13, %p549_p12 }
  0x18   : > { %p562_p3 = pneg %p561_p0 }
  0x1a   : > { %p569_p9 = pnand %p568_p10, %p562_p3 }
  0x1c   : > { %572 = shalt.err (!%p569_p9)
}
  0x1d   : > { %486 = dma.hbm_to_vmem [thread:$0]  (!%p781_p11), %s907_s1, 128, %s177_s28, [#allocation6]  }
  0x1e   : > { %s584_s12 = scalar_lea.vmem %s194_s30, 128  ;;  %p592_p13 = scmp.lt.s32.totalorder %s194_s30, %s194_s30 }
  0x1f   : > { %p585_p1 = scmp.ne.s32.totalorder %s194_s30, %s584_s12  ;;  %p593_p0 = scmp.lt.s32.totalorder %s584_s12, %s584_s12 }
  0x21   : > { %p587_p2 = pnand %p585_p1, %p549_p12  ;;  %p594_p4 = por %p593_p0, %p592_p13 }
  0x23   : > { %p588_p6 = pneg %p587_p2 }
  0x25   : > { %p595_p8 = pnand %p594_p4, %p588_p6 }
  0x27   : > { %598 = shalt.err (!%p595_p8)
}
  0x28   : > { %489 = dma.hbm_to_vmem [thread:$0]  (!%p781_p11), %s910_s4, 128, %s194_s30, [#allocation6]  }
  0x29   : > { %p27_p1 = scmp.eq.s32.totalorder %s26_s8, 0  ;;  %s29_s15 = sadd.s32 1, %s691_s20 }
  0x2a   : > { %p36_p2 = scmp.ne.s32.totalorder %s691_s20, %s687_s19  ;;  %p37_p4 = scmp.eq.s32.totalorder %s695_s21, 0 }
  0x2b   : > { %s813_s16 = scalar_select %p27_p1, %s691_s20, %s29_s15  }
  0x2c   : > { %p38_p6 = por %p37_p4, %p36_p2  ;;  %p920_p8 = scmp.eq.s32.totalorder %s753_s22, 1 }
  0x2d   : > { %p500_p12 = scmp.lt.s32.totalorder %s695_s21, 2  ;;  %s204_s23 = sand.u32 1, %s691_s20  }
  0x2e   : > { %p817_p9 = por %p920_p8, %p36_p2  ;;  %s456_s27 = sshll.u32 %s204_s23, 4 }
  0x2f   : > { %s469_s28 = sshll.u32 %s695_s21, 8  ;;  %s208_s8 = scalar_lea.vmem [#allocation2], %s456_s27 }
  0x30   : > { %s921_s17 = scalar_select %p817_p9, 1, 0 }
  0x31   : > { %s827_s30 = scalar_lea.hbm %s906_s0, %s469_s28  ;;  %s216_s9 = sshll.u32 %s208_s8, 4  ;;  %s217_s9 = int_to_ptr.vmem [resolvable:$true] %s216_s9 }
  0x32   : > { %p829_p11 = pnand %p500_p12, %p38_p6  ;;  %s205_s11 = scalar_lea.sflag [#allocation3], %s204_s23 }
  0x33   : > { %s599_s12 = scalar_lea.hbm %s827_s30, 256  ;;  %s604_s15 = scalar_lea.hbm %s906_s0, 512 }
  0x34   : > { %p600_p3 = scmp.ne.s32.totalorder %s827_s30, %s599_s12  ;;  %p601_p5 = pneg %p829_p11 }
  0x35   : > { %p605_p13 = scmp.lt.s32.totalorder %s827_s30, %s906_s0  ;;  %p606_p0 = scmp.lt.s32.totalorder %s604_s15, %s599_s12 }
  0x36   : > { %p602_p7 = pnand %p601_p5, %p600_p3 }
  0x37   : > { %p607_p1 = por %p606_p0, %p605_p13 }
  0x38   : > { %p603_p10 = pneg %p602_p7 }
  0x3a   : > { %p608_p2 = pnand %p607_p1, %p603_p10 }
  0x3c   : > { %611 = shalt.err (!%p608_p2)
}
  0x3d   : > { %s612_s29 = scalar_lea.vmem %s217_s9, 256  ;;  %s699_s23 = smov [#allocation2]  }
  0x3e   : > { %p613_p4 = scmp.ne.s32.totalorder %s217_s9, %s612_s29  ;;  %s617_s6 = sshll.u32 %s699_s23, 4  ;;  %s618_s6 = int_to_ptr.vmem [resolvable:$false] %s617_s6 }
  0x3f   : > { %s619_s8 = scalar_lea.vmem %s618_s6, 512  ;;  %p620_p12 = scmp.lt.s32.totalorder %s217_s9, %s618_s6 }
  0x40   : > { %p615_p6 = pnand %p613_p4, %p601_p5  ;;  %p621_p3 = scmp.lt.s32.totalorder %s619_s8, %s612_s29 }
  0x42   : > { %p616_p8 = pneg %p615_p6  ;;  %p622_p7 = por %p621_p3, %p620_p12 }
  0x44   : > { %p623_p9 = pnand %p622_p7, %p616_p8 }
  0x46   : > { %626 = shalt.err (!%p623_p9)
}
  0x47   : > { %493 = dma.hbm_to_vmem [thread:$0]  (!%p829_p11), %s827_s30, 256, %s217_s9, %s205_s11  }
  0x48   : > { %p923_p10 = scmp.ne.s32.totalorder %s918_s26, 0 }
  0x49   : > { %s850_s12 = sand.u32 (!%p923_p10), 1, %s687_s19   ;;  %p924_p5 = scmp.ne.s32.totalorder (!%p923_p10), %s916_s24, 0 }
  0x4a   : > { %225 = sbr.rel (%p923_p10) target bundleno = 583 (0x247), region = 40  ;;  %s460_s13 = sshll.u32 (!%p923_p10), %s850_s12, 4 }
  0x4b   : > { %s228_s14 = scalar_lea.sflag (!%p923_p10), [#allocation3], %s850_s12  ;;  %s231_s15 = scalar_lea.vmem (!%p923_p10), [#allocation2], %s460_s13 }
  0x4f   : > { %670 = dma.done.wait (%p924_p5), %s228_s14, 256  }
  0x50   : > { %672 = vsyncadd (%p924_p5), %s228_s14, 4294967040  ;;  %p925_p9 = scmp.eq.s32.totalorder %s753_s22, 0 }
  0x52   : > { %674 = dma.done.wait (%p925_p9), [#allocation6], 256   ;;  %p926_p11 = pmov %p925_p9 }
  0x53   : > { %v266_v0 = vld [vmem:[%s231_s15] sm:$0xff]  ;;  %v267_v1 = vld [vmem:[%s231_s15 + $0x8] sm:$0xff]  ;;  %vm274_vm0 = vcmask 64512   ;;  %v288_v12 = vlaneseq  ;;  %v700_v26 = vmov 0   ;;  %s463_s10 = sshll.u32 %s850_s12, 3  ;;  %s470_s11 = sshll.u32 %s753_s22, 7 }
  0x54   : > { %676 = vsyncadd (%p926_p11), [#allocation6], 4294967040  ;;  %v268_v2 = vadd.f32 %v267_v1, %v266_v0  ;;  %v272_v3 = vld [vmem:[#allocation5] sm:$0xff]  ;;  %v287_v22 = vld [vmem:[#allocation7] sm:$0xff]  ;;  %539 = vset.pattern.permute.xlu1 %v700_v26  ;;  %540 = vset.pattern.permute.xlu0 %v700_v26  ;;  %s265_s28 = scalar_lea.vmem [#allocation8], %s463_s10  ;;  %s360_s6 = scalar_lea.hbm %s911_s5, %s470_s11 }
  0x55   : > { %v282_v14 = vld [vmem:[%s908_s2] sm:$0x1]  ;;  %v289_v16 = vshrl.u32 %v288_v12, 7  ;;  %s362_s27 = sshll.u32 %s265_s28, 4  ;;  %s348_s8 = scalar_lea.sflag [#allocation4], %s850_s12  ;;  %s363_s27 = int_to_ptr.vmem [resolvable:$true] %s362_s27 }
  0x56   : > { %269 = vadd.xlane.f32.xlu0 %v268_v2  ;;  %v284_v17 = vld [vmem:[%s909_s3] sm:$0x1]  ;;  %s627_s13 = scalar_lea.vmem %s363_s27, 128  ;;  %p927_p0 = scmp.ne.s32.totalorder %s921_s17, 0 }
  0x57   : > { %v290_v20 = vsub.s32 0, %v289_v16  ;;  %p628_p13 = scmp.ne.s32.totalorder %s363_s27, %s627_s13  ;;  %s701_s14 = smov [#allocation8]  }
  0x58   : > { %s631_s15 = sshll.u32 %s701_s14, 4  ;;  %s632_s15 = int_to_ptr.vmem [resolvable:$false] %s631_s15 }
  0x59   : > { %p629_p1 = pnand %p628_p13, %p927_p0  ;;  %s633_s22 = scalar_lea.vmem %s632_s15, 256 }
  0x5a   : > { %p634_p4 = scmp.lt.s32.totalorder %s363_s27, %s632_s15  ;;  %p635_p6 = scmp.lt.s32.totalorder %s633_s22, %s627_s13 }
  0x5b   : > { %p630_p2 = pneg %p629_p1 }
  0x5c   : > { %p636_p8 = por %p635_p6, %p634_p4 }
  0x5e   : > { %p637_p12 = pnand %p636_p8, %p630_p2 }
  0xdf   : > { %v270_v4 = vpop.xlane.xlu0 %269 }
  0xe0   : > { %v271_v5 = vmul.f32 0.00390625, %v270_v4 }
  0xe2   : > { %v273_v6 = vmul.f32 %v272_v3, %v271_v5 }
  0xe4   : > { %v275_v7 = vsel %vm274_vm0, %v273_v6, 0.0 }
  0xe5   : > { %v276_v8 = vrot.slane %v275_v7, 4 }
  0xe7   : > { %v277_v9 = vadd.f32 %v276_v8, %v275_v7 }
  0xe9   : > { %v278_v10 = vrot.slane %v277_v9, 2 }
  0xeb   : > { %v279_v11 = vadd.f32 %v278_v10, %v277_v9 }
  0xed   : > { %v280_v13 = vrot.slane %v279_v11, 1 }
  0xef   : > { %v281_v15 = vadd.f32 %v280_v13, %v279_v11 }
  0xf1   : > { %v283_v18 = vmul.f32 %v282_v14, %v281_v15 }
  0xf3   : > { %v285_v19 = vadd.f32 %v284_v17, %v283_v18 }
  0xf5   : > { %v286_v21 = vmax.f32 %v285_v19, 0.0 }
  0xf7   : > { %v291_v23 = vrot.slane %v286_v21, %v290_v20 }
  0xf9   : > { %v292_v24 = vmul.f32 %v291_v23, %v287_v22 }
  0xfb   : > { %v293_v25 = vsel %vm274_vm0, %v292_v24, 0.0 }
  0xfc   : > { %294 = vadd.xlane.f32.xlu0 %v293_v25 }
 0x185   : > { %v295_v27 = vpop.xlane.xlu0 %294 }
 0x186   : > { %v297_v28 = vrot.slane %v295_v27, 4 }
 0x188   : > { %v299_v29 = vmax.f32 %v295_v27, %v297_v28 }
 0x18a   : > { %v300_v30 = vsub.f32 %v295_v27, %v299_v29  ;;  %v304_v31 = vrot.slane %v299_v29, 4 }
 0x18c   : > { %v306_v32 = vsub.f32 %v295_v27, %v304_v31  ;;  %v301_v33 = vmul.f32 1.442695, %v300_v30 }
 0x18e   : > { %v307_v34 = vmul.f32 1.442695, %v306_v32 }
 0x190   : > { %541 = vpow2.f32 %v307_v34 }
 0x191   : > { %543 = vpow2.f32 %v301_v33 }
 0x19d   : > { %v542_v35 = vpop.eup %541 }
 0x19e   : > { %v310_v36 = vrot.slane %v542_v35, 4  ;;  %v544_v37 = vpop.eup %543 }
 0x1a0   : > { %v312_v38 = vadd.f32 %v544_v37, %v310_v36 }
 0x1a2   : > { %545 = vrcp.f32 %v312_v38 }
 0x1af   : > { %v546_v39 = vpop.eup %545 }
 0x1b0   : > { %v324_v40 = vrot.slane %v546_v39, 4  ;;  %v315_v42 = vmul.f32 %v546_v39, %v544_v37 }
 0x1b2   : > { %v326_v41 = vmul.f32 %v542_v35, %v324_v40 }
 0x1b4   : > { %329 = vperm.xlu1 %539, %v326_v41  }
 0x1b8   : > { %318 = vperm.xlu1 %539, %v315_v42  }
 0x22f   : > { %v330_v43 = vpop.permute.xlu1 %329 }
 0x230   : > { %v332_v44 = vmul.f32 %v330_v43, %v266_v0  ;;  %v333_v45 = vmul.f32 %v330_v43, %v267_v1 }
 0x232   : > { %v336_v47 = vrot.slane %v332_v44, 4  ;;  %v337_v48 = vrot.slane %v333_v45, 4 }
 0x233   : > { %v319_v46 = vpop.permute.xlu1 %318 }
 0x234   : > { %v321_v49 = vmul.f32 %v319_v46, %v266_v0  ;;  %v322_v50 = vmul.f32 %v319_v46, %v267_v1 }
 0x236   : > { %v340_v51 = vadd.f32 %v336_v47, %v321_v49  ;;  %v341_v52 = vadd.f32 %v337_v48, %v322_v50 }
 0x238   : > { %v344_v53 = vcombine.low %v340_v51, %v341_v52 }
 0x23a   : > { %346 = vst [vmem:[%s265_s28] sm:$0xff] %v344_v53 }
 0x23b   : > { %640 = shalt.err (!%p637_p12)
}
 0x23c   : > { %s641_s24 = scalar_lea.hbm %s360_s6, 128  ;;  %s645_s30 = scalar_lea.hbm %s911_s5, 256 }
 0x23d   : > { %p642_p3 = scmp.ne.s32.totalorder %s360_s6, %s641_s24  ;;  %p646_p5 = scmp.lt.s32.totalorder %s360_s6, %s911_s5 }
 0x23e   : > { %p647_p9 = scmp.lt.s32.totalorder %s645_s30, %s641_s24 }
 0x23f   : > { %p643_p7 = pnand %p642_p3, %p927_p0 }
 0x240   : > { %p648_p11 = por %p647_p9, %p646_p5 }
 0x241   : > { %p644_p10 = pneg %p643_p7 }
 0x243   : > { %p649_p13 = pnand %p648_p11, %p644_p10 }
 0x245   : > { %652 = shalt.err (!%p649_p13)
}
 0x246   : > { %481 = dma.vmem_to_hbm [thread:$0]  (%p927_p0), %s363_s27, 128, %s360_s6, %s348_s8  }
 0x247 PF: > { %s374_s11 = sand.u32 1, %s683_s18   ;;  %p928_p1 = scmp.ne.s32.totalorder %s917_s25, 0 }
 0x248   : > { %p929_p2 = scmp.ge.s32.totalorder %s695_s21, 2  ;;  %s375_s28 = scalar_lea.sflag [#allocation4], %s374_s11 }
 0x24a   : > { %p495_p4 = pnand %p929_p2, %p928_p1 }
 0x24c   : > { %p496_p6 = pneg %p495_p4 }
 0x24e   : > { %678 = dma.done.wait (%p496_p6), %s375_s28, 128  }
 0x24f   : > { %680 = vsyncadd (%p496_p6), %s375_s28, 4294967168  ;;  %p19_p8 = scmp.ge.s32.totalorder %s786_s7, 4   ;;  %s930_s18 = smov %s687_s19 }
 0x250   : > { %s931_s19 = smov %s691_s20  ;;  %s932_s20 = smov %s813_s16 }
 0x251   : > { %s933_s21 = smov %s786_s7  ;;  %21 = sbr.rel (!%p19_p8) target bundleno = 6 (0x6), region = 93 }
 0x256   :  { %380 = vsyncpa [#allocation3], 1 }
 0x257   :  { %382 = vsyncpa [#allocation3 + $0x1], 1 }
 0x258   :  { %383 = vsyncpa [#allocation6], 1 }
 0x259   :  { %384 = vsyncpa [#allocation4], 1 }
 0x25a   :  { %386 = vsyncpa [#allocation4 + $0x1], 1 }

</bundles_post_ra>
